<compile_context>
chip_gen: v5e
topology: v5e:2x2
jax: 0.10.0
libtpu: 0.0.40
codegen_flags: <defaults>
</compile_context>

<pallas_src>
import jax
import jax.numpy as jnp
from jax.experimental import pallas as pl
from jax.experimental.pallas import tpu as pltpu


def mlp_kernel(xT_ref, w1_ref, b1_ref, w2_ref, b2_ref, w3_ref, b3_ref, o_ref):
    # Feature-major tiles: last (lane) dim is the batch tile TB (multiple of 128).
    xT = xT_ref[...]                    # (2, TB)   inputs, features on sublanes
    w1 = w1_ref[...]                    # (16, 2)   == PyTorch fc1.weight (out, in)
    b1 = b1_ref[...]                    # (16, 1)

    # ---- fc1 + ReLU: K=2 contraction as VPU broadcast FMAs (no MXU) ----
    h1 = w1[:, 0:1] * xT[0:1, :] + w1[:, 1:2] * xT[1:2, :] + b1     # (16, TB)
    h1 = jnp.maximum(h1, 0.0)

    # ---- fc2 + ReLU: 16x16 contraction on the MXU, lane-dense N = TB ----
    h2 = jnp.dot(w2_ref[...], h1, preferred_element_type=jnp.float32) + b2_ref[...]
    h2 = jnp.maximum(h2, 0.0)                                        # (16, TB)

    # ---- fc3: N=2 projection as VPU multiplies + XLU sublane reductions ----
    w3 = w3_ref[...]                    # (16, 2)   (in, out)
    b3 = b3_ref[...]                    # (2, 1)
    o0 = jnp.sum(h2 * w3[:, 0:1], axis=0, keepdims=True) + b3[0:1, 0:1]   # (1, TB)
    o1 = jnp.sum(h2 * w3[:, 1:2], axis=0, keepdims=True) + b3[1:2, 0:1]   # (1, TB)
    o_ref[0:1, :] = o0.astype(o_ref.dtype)
    o_ref[1:2, :] = o1.astype(o_ref.dtype)


def _round_up(n, m):
    return ((n + m - 1) // m) * m


def simple_net_forward(x, params, *, max_tile=1024):
    """x: (B, 2) float32, batch-major (PyTorch nn.Linear convention).

    params: w1 (2,16), b1 (1,16), w2 (16,16), b2 (1,16), w3 (16,2), b3 (1,2),
    weights stored as (in, out) so x @ w + b == PyTorch's x @ W.T + b.
    """
    B = x.shape[0]
    # Lane-dense batch tile: multiple of 128 lanes; cap at max_tile rows so
    # per-tile VMEM stays tiny and large B pipelines over several grid steps.
    TB = min(max_tile, _round_up(max(B, 1), 128))
    B_pad = _round_up(B, TB)

    # Layout plumbing in the wrapper (cheap XLA ops), so the kernel sees
    # feature-major, lane-dense tiles. Padded rows are sliced off at the end.
    x_pad = jnp.zeros((B_pad, 2), x.dtype).at[:B].set(x)
    xT = x_pad.T                                  # (2, B_pad)
    w1_k = params["w1"].T                         # (16, 2)
    b1_k = params["b1"].reshape(1, 16).T          # (16, 1)
    w2_k = params["w2"].T                         # (16, 16)
    b2_k = params["b2"].reshape(1, 16).T          # (16, 1)
    w3_k = params["w3"]                           # (16, 2)
    b3_k = params["b3"].reshape(1, 2).T           # (2, 1)

    # Constant index_map -> block never changes across the grid, so Pallas
    # keeps these resident in VMEM (no re-issued DMAs per batch tile).
    def const_spec(shape):
        return pl.BlockSpec(shape, lambda i: (0, 0))

    oT = pl.pallas_call(
        mlp_kernel,
        out_shape=jax.ShapeDtypeStruct((2, B_pad), jnp.float32),
        grid_spec=pltpu.PrefetchScalarGridSpec(
            num_scalar_prefetch=0,
            grid=(B_pad // TB,),
            in_specs=[
                pl.BlockSpec((2, TB), lambda i: (0, i)),   # xT batch tile
                const_spec(w1_k.shape), const_spec(b1_k.shape),
                const_spec(w2_k.shape), const_spec(b2_k.shape),
                const_spec(w3_k.shape), const_spec(b3_k.shape),
            ],
            out_specs=pl.BlockSpec((2, TB), lambda i: (0, i)),
        ),
        compiler_params=pltpu.CompilerParams(
            # Batch tiles are independent: shard across both TCs on v7x.
            dimension_semantics=("parallel",),
        ),
    )(xT, w1_k, b1_k, w2_k, b2_k, w3_k, b3_k)

    return oT.T[:B, :]                            # back to (B, 2) batch-major


def init_params(key):
    """Deterministic init mimicking PyTorch nn.Linear default:
    U(-1/sqrt(fan_in), 1/sqrt(fan_in)). Weights stored as (in, out)."""
    def linear(key, fan_in, fan_out):
        kw, kb = jax.random.split(key)
        bound = 1.0 / jnp.sqrt(fan_in)
        w = jax.random.uniform(kw, (fan_in, fan_out), jnp.float32, -bound, bound)
        b = jax.random.uniform(kb, (1, fan_out), jnp.float32, -bound, bound)
        return w, b

    k1, k2, k3 = jax.random.split(key, 3)
    w1, b1 = linear(k1, 2, 16)
    w2, b2 = linear(k2, 16, 16)
    w3, b3 = linear(k3, 16, 2)
    return {"w1": w1, "b1": b1, "w2": w2, "b2": b2, "w3": w3, "b3": b3}


def reference_forward(x, params):
    h1 = jnp.maximum(x @ params["w1"] + params["b1"], 0.0)
    h2 = jnp.maximum(h1 @ params["w2"] + params["b2"], 0.0)
    return h2 @ params["w3"] + params["b3"]


if __name__ == "__main__":
    key = jax.random.PRNGKey(0)
    kx, kp = jax.random.split(key)

    B = 8  # batch of (heads, legs)-style 2-feature inputs
    x = jax.random.uniform(kx, (B, 2), jnp.float32, 0.0, 100.0)
    params = init_params(kp)

    out = simple_net_forward(x, params)
    out = jax.block_until_ready(out)

    ref = reference_forward(x, params)
    assert out.shape == (B, 2)
    assert jnp.allclose(out, ref, atol=1e-3, rtol=1e-4), "mismatch vs reference"

    print("KERNEL_OK")
</pallas_src>

<mosaic_0001>
module attributes {stable_mosaic.version = 11 : i64} {
  func.func @mlp_kernel(%arg0: i32, %arg1: memref<2x128xf32, #tpu.memory_space<vmem>>, %arg2: memref<16x2xf32, #tpu.memory_space<vmem>>, %arg3: memref<16x1xf32, #tpu.memory_space<vmem>>, %arg4: memref<16x16xf32, #tpu.memory_space<vmem>>, %arg5: memref<16x1xf32, #tpu.memory_space<vmem>>, %arg6: memref<16x2xf32, #tpu.memory_space<vmem>>, %arg7: memref<2x1xf32, #tpu.memory_space<vmem>>, %arg8: memref<2x128xf32, #tpu.memory_space<vmem>>) attributes {dimension_semantics = [#tpu.dimension_semantics<parallel>], iteration_bounds = array<i64: 1>, scalar_prefetch = 0 : i64, scratch_operands = 0 : i64, tpu.core_type = #tpu.core_type<tc>, window_params = [{transform_indices = @transform_0, window_bounds = array<i64: 2, 128>}, {pipeline_mode = #tpu.pipeline_mode<synchronous>, transform_indices = @transform_1, window_bounds = array<i64: 16, 2>}, {pipeline_mode = #tpu.pipeline_mode<synchronous>, transform_indices = @transform_2, window_bounds = array<i64: 16, 1>}, {pipeline_mode = #tpu.pipeline_mode<synchronous>, transform_indices = @transform_3, window_bounds = array<i64: 16, 16>}, {pipeline_mode = #tpu.pipeline_mode<synchronous>, transform_indices = @transform_4, window_bounds = array<i64: 16, 1>}, {pipeline_mode = #tpu.pipeline_mode<synchronous>, transform_indices = @transform_5, window_bounds = array<i64: 16, 2>}, {pipeline_mode = #tpu.pipeline_mode<synchronous>, transform_indices = @transform_6, window_bounds = array<i64: 2, 1>}, {transform_indices = @transform_7, window_bounds = array<i64: 2, 128>}]} {
    %c0 = arith.constant 0 : index
    %c0_0 = arith.constant 0 : index
    %0 = vector.load %arg1[%c0, %c0_0] : memref<2x128xf32, #tpu.memory_space<vmem>>, vector<2x128xf32>
    %c0_1 = arith.constant 0 : index
    %c0_2 = arith.constant 0 : index
    %1 = vector.load %arg2[%c0_1, %c0_2] : memref<16x2xf32, #tpu.memory_space<vmem>>, vector<16x2xf32>
    %c0_3 = arith.constant 0 : index
    %c0_4 = arith.constant 0 : index
    %2 = vector.load %arg3[%c0_3, %c0_4] : memref<16x1xf32, #tpu.memory_space<vmem>>, vector<16x1xf32>
    %3 = vector.extract_strided_slice %1 {offsets = [0, 0], sizes = [16, 1], strides = [1, 1]} : vector<16x2xf32> to vector<16x1xf32>
    %4 = vector.extract_strided_slice %0 {offsets = [0, 0], sizes = [1, 128], strides = [1, 1]} : vector<2x128xf32> to vector<1x128xf32>
    %5 = vector.broadcast %3 : vector<16x1xf32> to vector<16x128xf32>
    %6 = vector.broadcast %4 : vector<1x128xf32> to vector<16x128xf32>
    %7 = arith.mulf %5, %6 : vector<16x128xf32>
    %8 = vector.extract_strided_slice %1 {offsets = [0, 1], sizes = [16, 1], strides = [1, 1]} : vector<16x2xf32> to vector<16x1xf32>
    %9 = vector.extract_strided_slice %0 {offsets = [1, 0], sizes = [1, 128], strides = [1, 1]} : vector<2x128xf32> to vector<1x128xf32>
    %10 = vector.broadcast %8 : vector<16x1xf32> to vector<16x128xf32>
    %11 = vector.broadcast %9 : vector<1x128xf32> to vector<16x128xf32>
    %12 = arith.mulf %10, %11 : vector<16x128xf32>
    %13 = arith.addf %7, %12 : vector<16x128xf32>
    %14 = vector.broadcast %2 : vector<16x1xf32> to vector<16x128xf32>
    %15 = arith.addf %13, %14 : vector<16x128xf32>
    %cst = arith.constant 0.000000e+00 : f32
    %16 = vector.broadcast %cst : f32 to vector<16x128xf32>
    %17 = arith.maximumf %15, %16 : vector<16x128xf32>
    %c0_5 = arith.constant 0 : index
    %c0_6 = arith.constant 0 : index
    %18 = vector.load %arg4[%c0_5, %c0_6] : memref<16x16xf32, #tpu.memory_space<vmem>>, vector<16x16xf32>
    %cst_7 = arith.constant dense<0.000000e+00> : vector<16x128xf32>
    %19 = tpu.matmul %18, %17, %cst_7 {dimension_numbers = #tpu.dot_dimension_numbers<[1], [0], [0], [1], [0, 0, 1, 1], [], []>} : vector<16x16xf32>, vector<16x128xf32>, vector<16x128xf32> -> vector<16x128xf32>
    %c0_8 = arith.constant 0 : index
    %c0_9 = arith.constant 0 : index
    %20 = vector.load %arg5[%c0_8, %c0_9] : memref<16x1xf32, #tpu.memory_space<vmem>>, vector<16x1xf32>
    %21 = vector.broadcast %20 : vector<16x1xf32> to vector<16x128xf32>
    %22 = arith.addf %19, %21 : vector<16x128xf32>
    %cst_10 = arith.constant 0.000000e+00 : f32
    %23 = vector.broadcast %cst_10 : f32 to vector<16x128xf32>
    %24 = arith.maximumf %22, %23 : vector<16x128xf32>
    %c0_11 = arith.constant 0 : index
    %c0_12 = arith.constant 0 : index
    %25 = vector.load %arg6[%c0_11, %c0_12] : memref<16x2xf32, #tpu.memory_space<vmem>>, vector<16x2xf32>
    %c0_13 = arith.constant 0 : index
    %c0_14 = arith.constant 0 : index
    %26 = vector.load %arg7[%c0_13, %c0_14] : memref<2x1xf32, #tpu.memory_space<vmem>>, vector<2x1xf32>
    %27 = vector.extract_strided_slice %25 {offsets = [0, 0], sizes = [16, 1], strides = [1, 1]} : vector<16x2xf32> to vector<16x1xf32>
    %28 = vector.broadcast %27 : vector<16x1xf32> to vector<16x128xf32>
    %29 = arith.mulf %24, %28 : vector<16x128xf32>
    %cst_15 = arith.constant dense<0.000000e+00> : vector<128xf32>
    %30 = vector.multi_reduction <add>, %29, %cst_15 [0] : vector<16x128xf32> to vector<128xf32>
    %31 = vector.shape_cast %30 : vector<128xf32> to vector<1x128xf32>
    %32 = vector.extract_strided_slice %26 {offsets = [0, 0], sizes = [1, 1], strides = [1, 1]} : vector<2x1xf32> to vector<1x1xf32>
    %33 = vector.broadcast %32 : vector<1x1xf32> to vector<1x128xf32>
    %34 = arith.addf %31, %33 : vector<1x128xf32>
    %35 = vector.extract_strided_slice %25 {offsets = [0, 1], sizes = [16, 1], strides = [1, 1]} : vector<16x2xf32> to vector<16x1xf32>
    %36 = vector.broadcast %35 : vector<16x1xf32> to vector<16x128xf32>
    %37 = arith.mulf %24, %36 : vector<16x128xf32>
    %cst_16 = arith.constant dense<0.000000e+00> : vector<128xf32>
    %38 = vector.multi_reduction <add>, %37, %cst_16 [0] : vector<16x128xf32> to vector<128xf32>
    %39 = vector.shape_cast %38 : vector<128xf32> to vector<1x128xf32>
    %40 = vector.extract_strided_slice %26 {offsets = [1, 0], sizes = [1, 1], strides = [1, 1]} : vector<2x1xf32> to vector<1x1xf32>
    %41 = vector.broadcast %40 : vector<1x1xf32> to vector<1x128xf32>
    %42 = arith.addf %39, %41 : vector<1x128xf32>
    %c0_17 = arith.constant 0 : index
    %c0_18 = arith.constant 0 : index
    %43 = vector.load %arg8[%c0_17, %c0_18] : memref<2x128xf32, #tpu.memory_space<vmem>>, vector<1x128xf32>
    tpu.vector_store %arg8[%c0_17, %c0_18], %34 {strides = array<i32>} : memref<2x128xf32, #tpu.memory_space<vmem>>, vector<1x128xf32>,
    %c1 = arith.constant 1 : index
    %c0_19 = arith.constant 0 : index
    %44 = vector.load %arg8[%c1, %c0_19] : memref<2x128xf32, #tpu.memory_space<vmem>>, vector<1x128xf32>
    tpu.vector_store %arg8[%c1, %c0_19], %42 {strides = array<i32>} : memref<2x128xf32, #tpu.memory_space<vmem>>, vector<1x128xf32>,
    return
  }
  func.func @transform_0(%arg0: i32) -> (i32, i32) {
    %c0_i32 = arith.constant 0 : i32
    %c0_i32_0 = arith.constant 0 : i32
    return %c0_i32, %arg0 : i32, i32
  }
  func.func @transform_1(%arg0: i32) -> (i32, i32) {
    %c0_i32 = arith.constant 0 : i32
    %c0_i32_0 = arith.constant 0 : i32
    %c0_i32_1 = arith.constant 0 : i32
    return %c0_i32, %c0_i32_0 : i32, i32
  }
  func.func @transform_2(%arg0: i32) -> (i32, i32) {
    %c0_i32 = arith.constant 0 : i32
    %c0_i32_0 = arith.constant 0 : i32
    %c0_i32_1 = arith.constant 0 : i32
    return %c0_i32, %c0_i32_0 : i32, i32
  }
  func.func @transform_3(%arg0: i32) -> (i32, i32) {
    %c0_i32 = arith.constant 0 : i32
    %c0_i32_0 = arith.constant 0 : i32
    %c0_i32_1 = arith.constant 0 : i32
    return %c0_i32, %c0_i32_0 : i32, i32
  }
  func.func @transform_4(%arg0: i32) -> (i32, i32) {
    %c0_i32 = arith.constant 0 : i32
    %c0_i32_0 = arith.constant 0 : i32
    %c0_i32_1 = arith.constant 0 : i32
    return %c0_i32, %c0_i32_0 : i32, i32
  }
  func.func @transform_5(%arg0: i32) -> (i32, i32) {
    %c0_i32 = arith.constant 0 : i32
    %c0_i32_0 = arith.constant 0 : i32
    %c0_i32_1 = arith.constant 0 : i32
    return %c0_i32, %c0_i32_0 : i32, i32
  }
  func.func @transform_6(%arg0: i32) -> (i32, i32) {
    %c0_i32 = arith.constant 0 : i32
    %c0_i32_0 = arith.constant 0 : i32
    %c0_i32_1 = arith.constant 0 : i32
    return %c0_i32, %c0_i32_0 : i32, i32
  }
  func.func @transform_7(%arg0: i32) -> (i32, i32) {
    %c0_i32 = arith.constant 0 : i32
    %c0_i32_0 = arith.constant 0 : i32
    return %c0_i32, %arg0 : i32, i32
  }
}

</mosaic_0001>

<bundles_post_ra>
// kernel: tpu_custom_call.1
= control target key start
LH: loop header
LB: loop body
LE: loop exit
PB: predicated region body
PF: predicated region fallthrough
CT: control target
= control target key end

     0   :  { %v226_v2 = vmov 0   ;;  %s308_s0 = inlined_call_operand.vmem [shape: f32[2,128], index: 0, kind: input, shape index: {}]   ;;  %s309_s1 = inlined_call_operand.vmem [shape: f32[16,2], index: 1, kind: input, shape index: {}]   ;;  %s310_s2 = inlined_call_operand.vmem [shape: f32[16,1], index: 2, kind: input, shape index: {}]   ;;  %s311_s3 = inlined_call_operand.vmem [shape: f32[16,16], index: 3, kind: input, shape index: {}]   ;;  %s312_s4 = inlined_call_operand.vmem [shape: f32[16,1], index: 4, kind: input, shape index: {}]   ;;  %s313_s5 = inlined_call_operand.vmem [shape: f32[16,2], index: 5, kind: input, shape index: {}]   ;;  %s314_s6 = inlined_call_operand.vmem [shape: f32[2,1], index: 6, kind: input, shape index: {}]   ;;  %s315_s7 = inlined_call_operand.hbm [shape: f32[2,128], index: 7, kind: output, shape index: {}]  }
   0x1   :  { %v29_v0 = vld [vmem:[%s309_s1 + $0x8] sm:$0xff]  ;;  %v28_v1 = vld [vmem:[%s309_s1] sm:$0xff]  ;;  %191 = vset.pattern.permute.xlu1 %v226_v2  ;;  %189 = vset.pattern.permute.xlu0 %v226_v2 }
   0x2   :  { %v31_v3 = vld [vmem:[%s310_s2 + $0x8] sm:$0xff] }
   0x3   :  { %12 = vsyncpa [#allocation3], 0  ;;  %39 = vperm.xlu0 %189, %v29_v0   ;;  %34 = vperm.xlu1 %191, %v28_v1   ;;  %v30_v4 = vld [vmem:[%s310_s2] sm:$0xff]  ;;  %v227_v5 = vmov 1   ;;  %v75_v6 = vld [vmem:[%s312_s4 + $0x8] sm:$0xff]  ;;  %vm86_vm0 = vcmask 130048  }
   0x4   :  { %193 = vset.pattern.permute.xlu2 %v226_v2  ;;  %v74_v7 = vld [vmem:[%s312_s4] sm:$0xff]  ;;  %v119_v8 = vld [vmem:[%s313_s5 + $0x8] sm:$0xff]  ;;  %s173_s22 = sshll.u32 %s315_s7, 4  ;;  %s174_s22 = int_to_ptr.hbm [resolvable:$true] %s173_s22 }
   0x5   :  { %65 = vperm.xlu2 %193, %v31_v3   ;;  %v118_v9 = vld [vmem:[%s313_s5] sm:$0xff]  ;;  %v73_v31 = vld [vmem:[%s311_s3 + $0x8] sm:$0xff] }
   0x6   :  { %v120_v10 = vld [vmem:[%s314_s6] sm:$0x3] }
   0x7   :  { %v27_v14 = vld [vmem:[%s308_s0] sm:$0x3] }
   0x8   :  { %v42_v15 = vperm.slane %v27_v14, 0  ;;  %v53_v16 = vperm.slane %v27_v14, 1  ;;  %v72_v30 = vld [vmem:[%s311_s3] sm:$0xff]  ;;  %s228_s3 = smov [#allocation2]  }
   0x9   :  { %s171_s19 = sshll.u32 %s228_s3, 4  ;;  %s172_s19 = int_to_ptr.vmem [resolvable:$true] %s171_s19 }
   0xb   :  { %190 = vset.pattern.permute.xlu0 %v227_v5  ;;  %192 = vset.pattern.permute.xlu1 %v227_v5 }
   0xc   :  { %50 = vperm.xlu0 %190, %v29_v0   ;;  %46 = vperm.xlu1 %192, %v28_v1  }
   0xd   :  { %60 = vperm.xlu2 %193, %v30_v4  }
  0x14   :  { %194 = vset.pattern.permute.xlu1 %v226_v2  ;;  %195 = vset.pattern.permute.xlu0 %v226_v2 }
  0x15   :  { %83 = vperm.xlu2 %193, %v75_v6   ;;  %78 = vperm.xlu1 %194, %v74_v7  }
  0x16   :  { %123 = vperm.xlu0 %195, %v118_v9  }
  0x1d   :  { %196 = vset.pattern.permute.xlu2 %v227_v5  ;;  %128 = vperm.xlu1 %194, %v119_v8  }
  0x1e   :  { %147 = vperm.xlu2 %196, %v118_v9   ;;  %199 = vset.pattern.permute.xlu0 %v227_v5 }
  0x25   :  { %197 = vset.pattern.permute.xlu1 %v227_v5 }
  0x26   :  { %151 = vperm.xlu1 %197, %v119_v8   ;;  %198 = vset.pattern.permute.xlu2 %v226_v2 }
  0x27   :  { %142 = vperm.xlu2 %198, %v120_v10  }
  0x5f   :  { %v66_v13 = vpop.permute.xlu2 %65 }
  0x67   :  { %v61_v25 = vpop.permute.xlu2 %60 }
  0x6f   :  { %v84_v33 = vpop.permute.xlu2 %83 }
  0x75   :  { %v40_v11 = vpop.permute.xlu0 %39  ;;  %v35_v12 = vpop.permute.xlu1 %34 }
  0x76   :  { %v44_v19 = vmul.f32 %v42_v15, %v40_v11  ;;  %v43_v20 = vmul.f32 %v42_v15, %v35_v12 }
  0x78   :  { %v148_v39 = vpop.permute.xlu2 %147 }
  0x7e   :  { %v51_v17 = vpop.permute.xlu0 %50  ;;  %v47_v18 = vpop.permute.xlu1 %46 }
  0x7f   :  { %v55_v21 = vmul.f32 %v53_v16, %v51_v17  ;;  %v54_v22 = vmul.f32 %v53_v16, %v47_v18 }
  0x81   :  { %v57_v23 = vadd.f32 %v55_v21, %v44_v19  ;;  %v56_v24 = vadd.f32 %v54_v22, %v43_v20  ;;  %v143_v60 = vpop.permute.xlu2 %142 }
  0x83   :  { %v69_v26 = vadd.f32 %v66_v13, %v57_v23  ;;  %v68_v27 = vadd.f32 %v61_v25, %v56_v24 }
  0x85   :  { %v71_v28 = vmax.f32 %v69_v26, 0.0  ;;  %v70_v29 = vmax.f32 %v68_v27, 0.0 }
  0x87   :  { %107 = vmatpush.msra.mxu0 %v71_v28  ;;  %184 = vmatpush.msra.mxu1 %v71_v28  ;;  %v79_v32 = vpop.permute.xlu1 %78 }
  0x88   :  { %v124_v40 = vpop.permute.xlu0 %123 }
  0x89   :  { %108 = vmatpush.msra.mxu0 %v70_v29  ;;  %185 = vmatpush.msra.mxu1 %v70_v29 }
  0x8a   :  { %182 = vmatmul.msk.f32.vlgmr.msra.gmra.mxu0 %vm86_vm0, %v72_v30  ;;  %183 = vmatmul.msk.f32.vlgmr.msra.gmra.mxu1 %vm86_vm0, %v73_v31 }
  0x8f   :  { %v129_v34 = vpop.permute.xlu1 %128 }
  0x98   :  { %v152_v41 = vpop.permute.xlu1 %151 }
 0x107   :  { %v110_v35 = vpop.f32.mrf.mxu0  ;;  %v113_v36 = vpop.f32.mrf.mxu1 }
 0x108   :  { %v111_v37 = vadd.f32 %v110_v35, %v79_v32  ;;  %v114_v38 = vadd.f32 %v113_v36, %v84_v33 }
 0x10a   :  { %v116_v42 = vmax.f32 %v111_v37, 0.0  ;;  %v117_v43 = vmax.f32 %v114_v38, 0.0 }
 0x10c   :  { %v132_v44 = vmul.f32 %v129_v34, %v117_v43  ;;  %v154_v45 = vmul.f32 %v148_v39, %v116_v42  ;;  %v131_v46 = vmul.f32 %v124_v40, %v116_v42  ;;  %v155_v47 = vmul.f32 %v152_v41, %v117_v43 }
 0x10e   :  { %v133_v48 = vadd.f32 %v132_v44, %v131_v46  ;;  %v156_v49 = vadd.f32 %v155_v47, %v154_v45 }
 0x110   :  { %v134_v50 = vrot.slane %v133_v48, 4  ;;  %v157_v51 = vrot.slane %v156_v49, 4 }
 0x112   :  { %v135_v52 = vadd.f32 %v134_v50, %v133_v48  ;;  %v158_v53 = vadd.f32 %v157_v51, %v156_v49 }
 0x114   :  { %v136_v54 = vrot.slane %v135_v52, 2  ;;  %v159_v55 = vrot.slane %v158_v53, 2 }
 0x116   :  { %v137_v56 = vadd.f32 %v136_v54, %v135_v52  ;;  %v160_v57 = vadd.f32 %v159_v55, %v158_v53 }
 0x118   :  { %v138_v58 = vrot.slane %v137_v56, 1  ;;  %v161_v59 = vrot.slane %v160_v57, 1 }
 0x11a   :  { %v139_v61 = vadd.f32 %v138_v58, %v137_v56  ;;  %v162_v62 = vadd.f32 %v161_v59, %v160_v57 }
 0x11c   :  { %v145_v63 = vadd.f32 %v143_v60, %v139_v61  ;;  %v163_v0 = vadd.f32 %v162_v62, %v143_v60 }
 0x11e   :  { %164 = vst [vmem:[#allocation2] sm:$0x1] %v145_v63 }
 0x11f   :  { %165 = vst [vmem:[#allocation2] sm:$0x2] %v163_v0 }
 0x120   :  { %176 = dma.vmem_to_hbm [thread:$0]  %s172_s19, 32, %s174_s22, [#allocation3]  }
 0x121   :  { %224 = dma.done.wait [#allocation3], 32  }
 0x122   :  { %225 = vsyncadd [#allocation3], 4294967264 }
 0x123   :  { %181 = vsyncpa [#allocation3], 1 }

</bundles_post_ra>
